<compile_context>
chip_gen: v5e
topology: v5e:2x2
jax: 0.10.0
libtpu: 0.0.40
codegen_flags: <defaults>
</compile_context>

<pallas_src>
import functools

import jax
import jax.numpy as jnp
import numpy as np
from jax.experimental import pallas as pl
from jax.experimental.pallas import tpu as pltpu


def _round_up(x, m):
    return ((x + m - 1) // m) * m


def _orthogonal(key, rows, cols, gain=1.0, dtype=jnp.float32):
    """Deterministic orthogonal init (same semantics as torch.nn.init.orthogonal_)."""
    n, m = rows, cols
    a = jax.random.normal(key, (max(n, m), min(n, m)), dtype=jnp.float32)
    q, r = jnp.linalg.qr(a)
    d = jnp.sign(jnp.diag(r))          # sign correction -> unique decomposition
    q = q * d[None, :]
    if n < m:
        q = q.T
    return (gain * q[:n, :m]).astype(dtype)


def _critic_mlp_kernel(xt_ref, w1_ref, b1_ref, w2_ref, b2_ref, w3_ref, b3_ref,
                       out_ref):
    """Fused transposed 3-layer MLP on one lane tile of the batch.

    xt:(D_in,TB)  w1:(H,D_in)  b1:(H,1)  w2:(H,H)  b2:(H,1)
    w3:(H,1)      b3:(1,1)     out:(1,TB)
    """
    xt = xt_ref[...]
    # fc1 + tanh: MXU matmul with N = TB lanes, f32 accumulation, f32 tanh.
    h1 = jnp.tanh(
        jnp.dot(w1_ref[...], xt, preferred_element_type=jnp.float32)
        + b1_ref[...])
    # fc2 + tanh (cast the activation back to the MXU operand dtype).
    h2 = jnp.tanh(
        jnp.dot(w2_ref[...], h1.astype(w2_ref.dtype),
                preferred_element_type=jnp.float32)
        + b2_ref[...])
    # fc3: (H,1) column * (H,TB) on the VPU, sublane reduce on the XLU.
    # Result is lane-dense (1, TB) -> unmasked vector stores.
    v = jnp.sum(h2 * w3_ref[...], axis=0, keepdims=True) + b3_ref[...]
    out_ref[...] = v.astype(out_ref.dtype)


def critic_mlp_forward(x, params, *, tile_cols=1024, mxu_dtype=None):
    """Runs the fused Pallas kernel. x: (B, D_in) float32 -> (B, 1) float32.

    tile_cols : max batch elements per grid step (lane tile; rounded to 128).
                On v5e/v6e prefer large tiles (serial grid); on v7x keep >= 2
                tiles when B is large so both TensorCores get work.
    mxu_dtype : optional (e.g. jnp.bfloat16) operand dtype for the two MXU
                matmuls on v6e/v7x; accumulation / bias / tanh stay f32.
    """
    w1, b1, w2, b2, w3, b3 = params
    B, d_in = x.shape
    H = w1.shape[0]

    # --- batch tile on the lane axis: multiple of 128, no ballooning padding.
    B128 = _round_up(B, 128)
    num_tiles = max(1, -(-B128 // max(tile_cols, 128)))     # ceil div
    TB = _round_up(-(-B128 // num_tiles), 128)
    B_pad = TB * num_tiles

    # Batch-on-lanes: feed X^T, zero-pad the padded batch columns (tanh(b) is
    # finite, rows are sliced off afterwards -> waste only, never wrongness).
    xt = x.T
    if B_pad != B:
        xt = jnp.pad(xt, ((0, 0), (0, B_pad - B)))

    if mxu_dtype is not None:
        xt = xt.astype(mxu_dtype)
        w1 = w1.astype(mxu_dtype)
        w2 = w2.astype(mxu_dtype)

    def resident(arr):
        # Full-array block with a constant index_map: stays VMEM-resident
        # across every batch tile.
        return pl.BlockSpec(arr.shape, lambda i: (0, 0))

    itemsize = jnp.dtype(xt.dtype).itemsize
    flops = 2 * B_pad * (d_in * H + H * H + H)
    transcendentals = 2 * B_pad * H
    bytes_accessed = (B_pad * d_in * itemsize + B_pad * 4
                      + (d_in * H + H * H) * itemsize
                      + (3 * H + 2) * 4)

    out = pl.pallas_call(
        _critic_mlp_kernel,
        out_shape=jax.ShapeDtypeStruct((1, B_pad), jnp.float32),
        grid=(num_tiles,),
        in_specs=[
            pl.BlockSpec((d_in, TB), lambda i: (0, i)),   # x^T: streamed, lane-tiled
            resident(w1), resident(b1),
            resident(w2), resident(b2),
            resident(w3), resident(b3),
        ],
        out_specs=pl.BlockSpec((1, TB), lambda i: (0, i)),  # lane-dense output slab
        compiler_params=pltpu.CompilerParams(
            dimension_semantics=("parallel",),
            vmem_limit_bytes=32 * 1024 * 1024,
        ),
        cost_estimate=pl.CostEstimate(
            flops=flops,
            transcendentals=transcendentals,
            bytes_accessed=bytes_accessed,
        ),
    )(xt, w1, b1, w2, b2, w3, b3)

    # Back to the torch (B, 1) layout (wrapper-side layout plumbing only).
    return out[0, :B][:, None]


def init_params(key, critic_input_dim, hidden_dim):
    """Orthogonal weights (gain=1.0), zero biases, stored for the transposed
    (batch-on-lanes) kernel:
      w1:(H,D_in)  w2:(H,H)  (torch (out,in) layout -> W @ X^T directly)
      w3:(H,1)     b1/b2:(H,1)   b3:(1,1)
    """
    k1, k2, k3 = jax.random.split(key, 3)
    w1 = _orthogonal(k1, hidden_dim, critic_input_dim)       # (H, D_in)
    w2 = _orthogonal(k2, hidden_dim, hidden_dim)             # (H, H)
    w3 = _orthogonal(k3, 1, hidden_dim).T                    # (H, 1)
    b1 = jnp.zeros((hidden_dim, 1), jnp.float32)
    b2 = jnp.zeros((hidden_dim, 1), jnp.float32)
    b3 = jnp.zeros((1, 1), jnp.float32)
    return (w1, b1, w2, b2, w3, b3)


def _reference(x, params):
    """Pure-JAX reference of the PyTorch forward (tanh activation)."""
    w1, b1, w2, b2, w3, b3 = params
    h = jnp.tanh(x @ w1.T + b1.T)
    h = jnp.tanh(h @ w2.T + b2.T)
    return h @ w3 + b3


if __name__ == "__main__":
    key = jax.random.PRNGKey(0)
    k_x, k_p = jax.random.split(key)

    batch = 8
    critic_input_dim = 16     # e.g. concatenated agent observations
    mlp_hidden_dim = 32       # args.mlp_hidden_dim

    x = jax.random.normal(k_x, (batch, critic_input_dim), dtype=jnp.float32)
    params = init_params(k_p, critic_input_dim, mlp_hidden_dim)
    ref = _reference(x, params)

    # 1) default f32 path
    fwd = jax.jit(functools.partial(critic_mlp_forward, tile_cols=1024))
    value = jax.block_until_ready(fwd(x, params))
    np.testing.assert_allclose(np.asarray(value), np.asarray(ref),
                               rtol=1e-5, atol=1e-5)
    assert value.shape == (batch, 1)

    # 2) multi-tile path (3 lane tiles of 128) exercising the pipelined x DMA
    x2 = jax.random.normal(k_x, (260, critic_input_dim), dtype=jnp.float32)
    fwd_tiled = jax.jit(functools.partial(critic_mlp_forward, tile_cols=128))
    value2 = jax.block_until_ready(fwd_tiled(x2, params))
    np.testing.assert_allclose(np.asarray(value2),
                               np.asarray(_reference(x2, params)),
                               rtol=1e-5, atol=1e-5)

    # 3) bf16 MXU operands (v6e/v7x fast path) — looser numeric tolerance
    fwd_bf16 = jax.jit(functools.partial(critic_mlp_forward,
                                         mxu_dtype=jnp.bfloat16))
    value3 = jax.block_until_ready(fwd_bf16(x, params))
    np.testing.assert_allclose(np.asarray(value3), np.asarray(ref),
                               rtol=5e-2, atol=5e-2)

    print("KERNEL_OK")
</pallas_src>

<mosaic_0001>
module attributes {stable_mosaic.version = 11 : i64} {
  func.func @_critic_mlp_kernel(%arg0: i32, %arg1: memref<16x128xf32, #tpu.memory_space<vmem>>, %arg2: memref<32x16xf32, #tpu.memory_space<vmem>>, %arg3: memref<32x1xf32, #tpu.memory_space<vmem>>, %arg4: memref<32x32xf32, #tpu.memory_space<vmem>>, %arg5: memref<32x1xf32, #tpu.memory_space<vmem>>, %arg6: memref<32x1xf32, #tpu.memory_space<vmem>>, %arg7: memref<1x1xf32, #tpu.memory_space<vmem>>, %arg8: memref<1x128xf32, #tpu.memory_space<vmem>>) attributes {dimension_semantics = [#tpu.dimension_semantics<parallel>], iteration_bounds = array<i64: 1>, scalar_prefetch = 0 : i64, scratch_operands = 0 : i64, tpu.core_type = #tpu.core_type<tc>, window_params = [{transform_indices = @transform_0, window_bounds = array<i64: 16, 128>}, {pipeline_mode = #tpu.pipeline_mode<synchronous>, transform_indices = @transform_1, window_bounds = array<i64: 32, 16>}, {pipeline_mode = #tpu.pipeline_mode<synchronous>, transform_indices = @transform_2, window_bounds = array<i64: 32, 1>}, {pipeline_mode = #tpu.pipeline_mode<synchronous>, transform_indices = @transform_3, window_bounds = array<i64: 32, 32>}, {pipeline_mode = #tpu.pipeline_mode<synchronous>, transform_indices = @transform_4, window_bounds = array<i64: 32, 1>}, {pipeline_mode = #tpu.pipeline_mode<synchronous>, transform_indices = @transform_5, window_bounds = array<i64: 32, 1>}, {pipeline_mode = #tpu.pipeline_mode<synchronous>, transform_indices = @transform_6, window_bounds = array<i64: 1, 1>}, {transform_indices = @transform_7, window_bounds = array<i64: 1, 128>}]} {
    %c0 = arith.constant 0 : index
    %c0_0 = arith.constant 0 : index
    %0 = vector.load %arg1[%c0, %c0_0] : memref<16x128xf32, #tpu.memory_space<vmem>>, vector<16x128xf32>
    %c0_1 = arith.constant 0 : index
    %c0_2 = arith.constant 0 : index
    %1 = vector.load %arg2[%c0_1, %c0_2] : memref<32x16xf32, #tpu.memory_space<vmem>>, vector<32x16xf32>
    %cst = arith.constant dense<0.000000e+00> : vector<32x128xf32>
    %2 = tpu.matmul %1, %0, %cst {dimension_numbers = #tpu.dot_dimension_numbers<[1], [0], [0], [1], [0, 0, 1, 1], [], []>} : vector<32x16xf32>, vector<16x128xf32>, vector<32x128xf32> -> vector<32x128xf32>
    %c0_3 = arith.constant 0 : index
    %c0_4 = arith.constant 0 : index
    %3 = vector.load %arg3[%c0_3, %c0_4] : memref<32x1xf32, #tpu.memory_space<vmem>>, vector<32x1xf32>
    %4 = vector.broadcast %3 : vector<32x1xf32> to vector<32x128xf32>
    %5 = arith.addf %2, %4 : vector<32x128xf32>
    %6 = math.tanh %5 : vector<32x128xf32>
    %c0_5 = arith.constant 0 : index
    %c0_6 = arith.constant 0 : index
    %7 = vector.load %arg4[%c0_5, %c0_6] : memref<32x32xf32, #tpu.memory_space<vmem>>, vector<32x32xf32>
    %cst_7 = arith.constant dense<0.000000e+00> : vector<32x128xf32>
    %8 = tpu.matmul %7, %6, %cst_7 {dimension_numbers = #tpu.dot_dimension_numbers<[1], [0], [0], [1], [0, 0, 1, 1], [], []>} : vector<32x32xf32>, vector<32x128xf32>, vector<32x128xf32> -> vector<32x128xf32>
    %c0_8 = arith.constant 0 : index
    %c0_9 = arith.constant 0 : index
    %9 = vector.load %arg5[%c0_8, %c0_9] : memref<32x1xf32, #tpu.memory_space<vmem>>, vector<32x1xf32>
    %10 = vector.broadcast %9 : vector<32x1xf32> to vector<32x128xf32>
    %11 = arith.addf %8, %10 : vector<32x128xf32>
    %12 = math.tanh %11 : vector<32x128xf32>
    %c0_10 = arith.constant 0 : index
    %c0_11 = arith.constant 0 : index
    %13 = vector.load %arg6[%c0_10, %c0_11] : memref<32x1xf32, #tpu.memory_space<vmem>>, vector<32x1xf32>
    %14 = vector.broadcast %13 : vector<32x1xf32> to vector<32x128xf32>
    %15 = arith.mulf %12, %14 : vector<32x128xf32>
    %cst_12 = arith.constant dense<0.000000e+00> : vector<128xf32>
    %16 = vector.multi_reduction <add>, %15, %cst_12 [0] : vector<32x128xf32> to vector<128xf32>
    %17 = vector.shape_cast %16 : vector<128xf32> to vector<1x128xf32>
    %c0_13 = arith.constant 0 : index
    %c0_14 = arith.constant 0 : index
    %18 = vector.load %arg7[%c0_13, %c0_14] : memref<1x1xf32, #tpu.memory_space<vmem>>, vector<1x1xf32>
    %19 = vector.broadcast %18 : vector<1x1xf32> to vector<1x128xf32>
    %20 = arith.addf %17, %19 : vector<1x128xf32>
    %c0_15 = arith.constant 0 : index
    %c0_16 = arith.constant 0 : index
    %21 = vector.load %arg8[%c0_15, %c0_16] : memref<1x128xf32, #tpu.memory_space<vmem>>, vector<1x128xf32>
    tpu.vector_store %arg8[%c0_15, %c0_16], %20 {strides = array<i32>} : memref<1x128xf32, #tpu.memory_space<vmem>>, vector<1x128xf32>,
    return
  }
  func.func @transform_0(%arg0: i32) -> (i32, i32) {
    %c0_i32 = arith.constant 0 : i32
    %c0_i32_0 = arith.constant 0 : i32
    return %c0_i32, %arg0 : i32, i32
  }
  func.func @transform_1(%arg0: i32) -> (i32, i32) {
    %c0_i32 = arith.constant 0 : i32
    %c0_i32_0 = arith.constant 0 : i32
    %c0_i32_1 = arith.constant 0 : i32
    return %c0_i32, %c0_i32_0 : i32, i32
  }
  func.func @transform_2(%arg0: i32) -> (i32, i32) {
    %c0_i32 = arith.constant 0 : i32
    %c0_i32_0 = arith.constant 0 : i32
    %c0_i32_1 = arith.constant 0 : i32
    return %c0_i32, %c0_i32_0 : i32, i32
  }
  func.func @transform_3(%arg0: i32) -> (i32, i32) {
    %c0_i32 = arith.constant 0 : i32
    %c0_i32_0 = arith.constant 0 : i32
    %c0_i32_1 = arith.constant 0 : i32
    return %c0_i32, %c0_i32_0 : i32, i32
  }
  func.func @transform_4(%arg0: i32) -> (i32, i32) {
    %c0_i32 = arith.constant 0 : i32
    %c0_i32_0 = arith.constant 0 : i32
    %c0_i32_1 = arith.constant 0 : i32
    return %c0_i32, %c0_i32_0 : i32, i32
  }
  func.func @transform_5(%arg0: i32) -> (i32, i32) {
    %c0_i32 = arith.constant 0 : i32
    %c0_i32_0 = arith.constant 0 : i32
    %c0_i32_1 = arith.constant 0 : i32
    return %c0_i32, %c0_i32_0 : i32, i32
  }
  func.func @transform_6(%arg0: i32) -> (i32, i32) {
    %c0_i32 = arith.constant 0 : i32
    %c0_i32_0 = arith.constant 0 : i32
    %c0_i32_1 = arith.constant 0 : i32
    return %c0_i32, %c0_i32_0 : i32, i32
  }
  func.func @transform_7(%arg0: i32) -> (i32, i32) {
    %c0_i32 = arith.constant 0 : i32
    %c0_i32_0 = arith.constant 0 : i32
    return %c0_i32, %arg0 : i32, i32
  }
}

</mosaic_0001>

<bundles_post_ra>
// kernel: critic_mlp_forward.1
= control target key start
LH: loop header
LB: loop body
LE: loop exit
PB: predicated region body
PF: predicated region fallthrough
CT: control target
= control target key end

     0   :  { %v262_v0 = vmov 0   ;;  %vm58_vm0 = vcmask 130048   ;;  %vm132_vm1 = vcmask 261120   ;;  %s379_s2 = inlined_call_operand.vmem [shape: f32[32,1], index: 2, kind: input, shape index: {}]   ;;  %s380_s0 = inlined_call_operand.vmem [shape: f32[16,128], index: 0, kind: input, shape index: {}]   ;;  %s381_s1 = inlined_call_operand.vmem [shape: f32[32,16], index: 1, kind: input, shape index: {}]   ;;  %s382_s6 = inlined_call_operand.<no memory space> [shape: f32[1,1], index: 6, kind: input, shape index: {}]   ;;  %s383_s4 = inlined_call_operand.vmem [shape: f32[32,1], index: 4, kind: input, shape index: {}]   ;;  %s384_s5 = inlined_call_operand.vmem [shape: f32[32,1], index: 5, kind: input, shape index: {}]   ;;  %s385_s3 = inlined_call_operand.vmem [shape: f32[32,32], index: 3, kind: input, shape index: {}]   ;;  %s386_s7 = inlined_call_operand.vmem [shape: f32[1,128], index: 7, kind: output, shape index: {}]  }
   0x1   :  { %243 = vset.pattern.permute.xlu0 %v262_v0  ;;  %v37_v1 = vld [vmem:[%s379_s2 + $0x18] sm:$0xff]  ;;  %v29_v2 = vld [vmem:[%s380_s0 + $0x8] sm:$0xff]  ;;  %v28_v3 = vld [vmem:[%s380_s0] sm:$0xff]  ;;  %244 = vset.pattern.permute.xlu1 %v262_v0  ;;  %v12_v4 = vstv %s382_s6 }
   0x2   :  { %55 = vperm.xlu0 %243, %v37_v1   ;;  %236 = vmatpush.msra.mxu3 %v29_v2  ;;  %v31_v5 = vld [vmem:[%s381_s1 + $0x8] sm:$0xff]  ;;  %13 = vst [vmem:[#allocation2] sm:$0x1] %v12_v4  ;;  %v30_v7 = vld [vmem:[%s381_s1] sm:$0xff]  ;;  %v36_v8 = vld [vmem:[%s379_s2 + $0x10] sm:$0xff] }
   0x3   :  { %v35_v6 = vld [vmem:[%s379_s2 + $0x8] sm:$0xff]  ;;  %85 = vmatpush.msra.mxu0 %v29_v2  ;;  %245 = vset.pattern.permute.xlu2 %v262_v0  ;;  %v34_v9 = vld [vmem:[%s379_s2] sm:$0xff]  ;;  %v32_v10 = vld [vmem:[%s381_s1 + $0x10] sm:$0xff] }
   0x4   :  { %45 = vperm.xlu1 %244, %v35_v6   ;;  %237 = vmatpush.msra.mxu3 %v28_v3  ;;  %v110_v11 = vld [vmem:[%s383_s4 + $0x10] sm:$0xff]  ;;  %v111_v12 = vld [vmem:[%s383_s4 + $0x18] sm:$0xff]  ;;  %v179_v14 = vld [vmem:[%s384_s5 + $0x8] sm:$0xff] }
   0x5   :  { %229 = vmatmul.msk.f32.vlgmr.msra.gmra.mxu3 %vm58_vm0, %v31_v5  ;;  %86 = vmatpush.msra.mxu0 %v28_v3  ;;  %v33_v13 = vld [vmem:[%s381_s1 + $0x18] sm:$0xff]  ;;  %v180_v15 = vld [vmem:[%s384_s5 + $0x10] sm:$0xff]  ;;  %v108_v20 = vld [vmem:[%s383_s4] sm:$0xff] }
   0x6   :  { %228 = vmatmul.msk.f32.vlgmr.msra.gmra.mxu0 %vm58_vm0, %v30_v7  ;;  %114 = vperm.xlu2 %245, %v108_v20   ;;  %v109_v22 = vld [vmem:[%s383_s4 + $0x8] sm:$0xff]  ;;  %v178_v31 = vld [vmem:[%s384_s5] sm:$0xff]  ;;  %v106_v36 = vld [vmem:[%s385_s3 + $0x10] sm:$0xff] }
   0x7   :  { %v104_v35 = vld [vmem:[%s385_s3] sm:$0xff]  ;;  %v181_v38 = vld [vmem:[%s384_s5 + $0x18] sm:$0xff]  ;;  %v105_v39 = vld [vmem:[%s385_s3 + $0x8] sm:$0xff] }
   0x8   :  { %v107_v40 = vld [vmem:[%s385_s3 + $0x18] sm:$0xff] }
   0x9   :  { %v215_v16 = vld [vmem:[#allocation2] sm:$0x1] }
   0xa   :  { %50 = vperm.xlu0 %243, %v36_v8  }
   0xc   :  { %40 = vperm.xlu1 %244, %v34_v9  }
   0xd   :  { %230 = vmatmul.msk.f32.gmra.mxu3 %vm58_vm0, %v32_v10 }
   0xe   :  { %119 = vperm.xlu2 %245, %v109_v22  }
  0x12   :  { %124 = vperm.xlu0 %243, %v110_v11  }
  0x14   :  { %129 = vperm.xlu1 %244, %v111_v12  }
  0x15   :  { %231 = vmatmul.msk.f32.gmra.mxu3 %vm58_vm0, %v33_v13 }
  0x16   :  { %184 = vperm.xlu2 %245, %v178_v31  }
  0x1a   :  { %189 = vperm.xlu0 %243, %v179_v14  }
  0x1c   :  { %194 = vperm.xlu1 %244, %v180_v15  }
  0x1e   :  { %199 = vperm.xlu2 %245, %v181_v38  }
  0x22   :  { %218 = vperm.xlu0 %243, %v215_v16  }
  0x60   :  { %v115_v41 = vpop.permute.xlu2 %114 }
  0x68   :  { %v120_v43 = vpop.permute.xlu2 %119 }
  0x70   :  { %v185_v51 = vpop.permute.xlu2 %184 }
  0x74   :  { %v56_v18 = vpop.permute.xlu0 %55 }
  0x76   :  { %v46_v21 = vpop.permute.xlu1 %45 }
  0x78   :  { %v200_v0 = vpop.permute.xlu2 %199 }
  0x7c   :  { %v51_v23 = vpop.permute.xlu0 %50 }
  0x7e   :  { %v41_v29 = vpop.permute.xlu1 %40 }
  0x83   :  { %v88_v27 = vpop.f32.mrf.mxu0 }
  0x84   :  { %v89_v30 = vadd.f32 %v88_v27, %v41_v29  ;;  %v125_v46 = vpop.permute.xlu0 %124 }
  0x86   :  { %v130_v50 = vpop.permute.xlu1 %129 }
  0x88   :  { %v91_v17 = vpop.f32.mrf.mxu3 }
  0x89   :  { %v92_v28 = vadd.f32 %v91_v17, %v46_v21 }
  0x8c   :  { %v190_v56 = vpop.permute.xlu0 %189 }
  0x8e   :  { %v195_v61 = vpop.permute.xlu1 %194 }
  0x90   :  { %v94_v19 = vpop.f32.mrf.mxu3 }
  0x91   :  { %v95_v25 = vadd.f32 %v94_v19, %v51_v23 }
  0x94   :  { %v219_v8 = vpop.permute.xlu0 %218 }
  0x95   :  { %v221_v10 = vperm.slane %v219_v8, 0 }
  0x98   :  { %v97_v24 = vpop.f32.mrf.mxu3 }
  0x99   :  { %v98_v26 = vadd.f32 %v97_v24, %v56_v18 }
  0x9b   :  { %246 = vtanh.f32 %v98_v26 }
  0x9c   :  { %248 = vtanh.f32 %v95_v25 }
  0x9d   :  { %250 = vtanh.f32 %v92_v28 }
  0x9e   :  { %252 = vtanh.f32 %v89_v30 }
  0xa1   :  { %v247_v32 = vpop.eup %246 }
  0xa2   :  { %157 = vmatpush.msra.mxu1 %v247_v32  ;;  %238 = vmatpush.msra.mxu2 %v247_v32  ;;  %v249_v33 = vpop.eup %248 }
  0xa3   :  { %v251_v34 = vpop.eup %250 }
  0xa4   :  { %158 = vmatpush.msra.mxu1 %v249_v33  ;;  %239 = vmatpush.msra.mxu2 %v249_v33  ;;  %v253_v37 = vpop.eup %252 }
  0xa6   :  { %159 = vmatpush.msra.mxu1 %v251_v34  ;;  %240 = vmatpush.msra.mxu2 %v251_v34 }
  0xa8   :  { %160 = vmatpush.msra.mxu1 %v253_v37  ;;  %241 = vmatpush.msra.mxu2 %v253_v37 }
  0xa9   :  { %232 = vmatmul.msk.f32.vlgmr.msra.gmra.mxu1 %vm132_vm1, %v104_v35  ;;  %234 = vmatmul.msk.f32.vlgmr.msra.gmra.mxu2 %vm132_vm1, %v106_v36 }
  0xb1   :  { %233 = vmatmul.msk.f32.gmra.mxu1 %vm132_vm1, %v105_v39  ;;  %235 = vmatmul.msk.f32.gmra.mxu2 %vm132_vm1, %v107_v40 }
 0x126   :  { %v162_v42 = vpop.f32.mrf.mxu1 }
 0x127   :  { %v163_v44 = vadd.f32 %v162_v42, %v115_v41 }
 0x129   :  { %254 = vtanh.f32 %v163_v44 }
 0x12c   :  { %v168_v45 = vpop.f32.mrf.mxu2 }
 0x12d   :  { %v169_v48 = vadd.f32 %v168_v45, %v125_v46 }
 0x12e   :  { %v165_v47 = vpop.f32.mrf.mxu1 }
 0x12f   :  { %v166_v49 = vadd.f32 %v165_v47, %v120_v43  ;;  %v255_v53 = vpop.eup %254 }
 0x130   :  { %v202_v57 = vmul.f32 %v255_v53, %v185_v51 }
 0x131   :  { %256 = vtanh.f32 %v166_v49 }
 0x132   :  { %258 = vtanh.f32 %v169_v48 }
 0x134   :  { %v171_v52 = vpop.f32.mrf.mxu2 }
 0x135   :  { %v172_v54 = vadd.f32 %v171_v52, %v130_v50 }
 0x137   :  { %v257_v55 = vpop.eup %256  ;;  %260 = vtanh.f32 %v172_v54 }
 0x138   :  { %v203_v58 = vmul.f32 %v257_v55, %v190_v56  ;;  %v259_v59 = vpop.eup %258 }
 0x139   :  { %v204_v62 = vmul.f32 %v259_v59, %v195_v61 }
 0x13a   :  { %v206_v60 = vadd.f32 %v203_v58, %v202_v57 }
 0x13c   :  { %v207_v2 = vadd.f32 %v206_v60, %v204_v62 }
 0x13d   :  { %v261_v63 = vpop.eup %260 }
 0x13e   :  { %v205_v1 = vmul.f32 %v261_v63, %v200_v0 }
 0x140   :  { %v208_v3 = vadd.f32 %v207_v2, %v205_v1 }
 0x142   :  { %v209_v4 = vrot.slane %v208_v3, 4 }
 0x144   :  { %v210_v5 = vadd.f32 %v209_v4, %v208_v3 }
 0x146   :  { %v211_v6 = vrot.slane %v210_v5, 2 }
 0x148   :  { %v212_v7 = vadd.f32 %v211_v6, %v210_v5 }
 0x14a   :  { %v213_v9 = vrot.slane %v212_v7, 1 }
 0x14c   :  { %v214_v11 = vadd.f32 %v213_v9, %v212_v7 }
 0x14e   :  { %v222_v12 = vadd.f32 %v221_v10, %v214_v11 }
 0x150   :  { %223 = vst [vmem:[%s386_s7] sm:$0x1] %v222_v12 }

</bundles_post_ra>
